<compile_context>
chip_gen: v6e
topology: v6e:2x2x1
jax: 0.10.0
libtpu: 0.0.40
codegen_flags: <defaults>
</compile_context>

<pallas_src>
import functools

import jax
import jax.numpy as jnp
from jax.experimental import pallas as pl
from jax.experimental.pallas import tpu as pltpu


def _round_up(x, m):
    return (x + m - 1) // m * m


def _ffn_kernel_resident(x_ref, w1_ref, b1_ref, w2_ref, b2_ref, o_ref, *,
                         compute_dtype):
    """Single-pass kernel: full (padded) W1/W2 resident in VMEM."""
    x = x_ref[...].astype(compute_dtype)          # in-kernel cast (f32 -> cdt)
    h = jnp.dot(x, w1_ref[...], preferred_element_type=jnp.float32)
    h = jnp.maximum(h + b1_ref[...], 0.0)          # bias1 (f32) + ReLU
    # (dropout: identity in eval mode)
    out = jnp.dot(h.astype(w2_ref.dtype), w2_ref[...],
                  preferred_element_type=jnp.float32)
    o_ref[...] = (out + b2_ref[...]).astype(o_ref.dtype)


def _ffn_kernel_chunked(x_ref, w1_ref, b1_ref, w2_ref, b2_ref, o_ref, acc_ref,
                        *, compute_dtype):
    """d_ff-chunked kernel: reduction grid axis + f32 VMEM accumulator."""
    k = pl.program_id(1)

    @pl.when(k == 0)
    def _():
        acc_ref[...] = jnp.zeros_like(acc_ref)

    x = x_ref[...].astype(compute_dtype)
    h = jnp.dot(x, w1_ref[...], preferred_element_type=jnp.float32)
    h = jnp.maximum(h + b1_ref[...], 0.0)          # b1 chunk (1, tk), f32
    # (dropout: identity in eval mode)
    acc_ref[...] += jnp.dot(h.astype(w2_ref.dtype), w2_ref[...],
                            preferred_element_type=jnp.float32)

    @pl.when(k == pl.num_programs(1) - 1)
    def _():
        o_ref[...] = (acc_ref[...] + b2_ref[...]).astype(o_ref.dtype)


def _pad2d(a, rows, cols):
    pr, pc = rows - a.shape[0], cols - a.shape[1]
    if pr == 0 and pc == 0:          # trace-time check: skip no-op pads
        return a
    return jnp.pad(a, ((0, pr), (0, pc)))


def feed_forward(x, w1, b1, w2, b2, *, row_tile=512, dff_tile=None,
                 compute_dtype=jnp.bfloat16):
    """x: (batch, seq, d_model) -> (batch, seq, d_model).

    row_tile      : rows (batch*seq) per grid step — weight-amortization knob.
    dff_tile      : explicit d_ff chunk size (forces the chunked path when
                    smaller than padded d_ff); default lets the kernel keep
                    the full weights VMEM-resident when they fit.
    compute_dtype : MXU operand dtype (default bf16, f32 accumulation kept).
                    Pass jnp.float32 for exact-parity mode.
    """
    batch, seq, d_model = x.shape
    d_ff = w1.shape[1]
    rows = batch * seq
    out_dtype = x.dtype
    cdt = jnp.dtype(compute_dtype)

    x_isz = jnp.dtype(x.dtype).itemsize
    w_isz = cdt.itemsize
    o_isz = jnp.dtype(out_dtype).itemsize

    # Lane/MXU-friendly padded dims (zero padding is mathematically inert).
    d_model_p = _round_up(d_model, 128)
    d_ff_p = _round_up(d_ff, 256)          # 256-aligned for v6e/v7x MXU

    # Row tiling (sublane aligned, works for f32 and bf16 intermediates).
    row_tile = max(16, min(row_tile, _round_up(rows, 16)))
    row_tile = _round_up(row_tile, 16)
    rows_p = _round_up(rows, row_tile)
    n_row_tiles = rows_p // row_tile

    # Generation-aware VMEM budget (v5e/v6e ~128 MiB, v7x ~64 MiB per TC).
    try:
        vmem_cap = int(pltpu.get_tpu_info().vmem_capacity_bytes)
    except Exception:
        vmem_cap = 64 * 1024 * 1024        # conservative fallback
    vmem_budget = int(vmem_cap * 0.85)

    # Footprint if the FULL weight set stays resident (count double buffers
    # conservatively, plus the f32 intermediates Mosaic materializes in VMEM).
    resident_need = (
        2 * row_tile * d_model_p * x_isz               # x tiles
        + 2 * row_tile * d_model_p * o_isz             # out tiles
        + 2 * 2 * d_model_p * d_ff_p * w_isz           # W1 + W2 (2x buffered)
        + 2 * (d_ff_p + d_model_p) * 4                 # biases
        + row_tile * d_ff_p * (4 + w_isz)              # h (f32) + bf16 copy
        + row_tile * d_model_p * 4                     # 2nd matmul f32 result
    )

    want_resident = (dff_tile is None or dff_tile >= d_ff_p)
    resident = want_resident and resident_need <= vmem_budget

    x2d = _pad2d(x.reshape(rows, d_model), rows_p, d_model_p)   # keep x dtype

    if resident:
        d_ff_pad = d_ff_p
        grid = (n_row_tiles,)
        in_specs = [
            pl.BlockSpec((row_tile, d_model_p), lambda i: (i, 0)),
            pl.BlockSpec((d_model_p, d_ff_pad), lambda i: (0, 0)),
            pl.BlockSpec((1, d_ff_pad), lambda i: (0, 0)),
            pl.BlockSpec((d_ff_pad, d_model_p), lambda i: (0, 0)),
            pl.BlockSpec((1, d_model_p), lambda i: (0, 0)),
        ]
        out_specs = pl.BlockSpec((row_tile, d_model_p), lambda i: (i, 0))
        scratch_shapes = []
        dim_sem = ("parallel",)
        kernel = functools.partial(_ffn_kernel_resident, compute_dtype=cdt)
        vmem_est = resident_need
        weight_bytes_accessed = 2 * d_model_p * d_ff_pad * w_isz   # once
    else:
        tk = dff_tile if dff_tile is not None else 1024
        tk = _round_up(min(tk, d_ff_p), 256)
        d_ff_pad = _round_up(d_ff_p, tk)            # k axis always full tiles
        n_k = d_ff_pad // tk
        grid = (n_row_tiles, n_k)
        in_specs = [
            pl.BlockSpec((row_tile, d_model_p), lambda i, k: (i, 0)),
            pl.BlockSpec((d_model_p, tk), lambda i, k: (0, k)),
            pl.BlockSpec((1, tk), lambda i, k: (0, k)),
            pl.BlockSpec((tk, d_model_p), lambda i, k: (k, 0)),
            pl.BlockSpec((1, d_model_p), lambda i, k: (0, 0)),
        ]
        out_specs = pl.BlockSpec((row_tile, d_model_p), lambda i, k: (i, 0))
        scratch_shapes = [pltpu.VMEM((row_tile, d_model_p), jnp.float32)]
        dim_sem = ("parallel", "arbitrary")
        kernel = functools.partial(_ffn_kernel_chunked, compute_dtype=cdt)
        vmem_est = (
            2 * row_tile * d_model_p * x_isz
            + 2 * row_tile * d_model_p * o_isz
            + 2 * 2 * d_model_p * tk * w_isz
            + 2 * (tk + d_model_p) * 4
            + row_tile * tk * (4 + w_isz)
            + 2 * row_tile * d_model_p * 4            # acc scratch + chunk
        )
        # Weights are re-streamed once per row tile.
        weight_bytes_accessed = n_row_tiles * 2 * d_model_p * d_ff_pad * w_isz

    vmem_limit = int(min(max(vmem_est * 5 // 4, 32 * 1024 * 1024),
                         vmem_budget))

    # Pad / cast weights & biases (zero padding inert; under jit with constant
    # weights this folds — cache padded weights outside for inference loops).
    w1_p = _pad2d(w1.astype(cdt), d_model_p, d_ff_pad)
    w2_p = _pad2d(w2.astype(cdt), d_ff_pad, d_model_p)
    b1_p = _pad2d(b1.astype(jnp.float32).reshape(1, d_ff), 1, d_ff_pad)
    b2_p = _pad2d(b2.astype(jnp.float32).reshape(1, d_model), 1, d_model_p)

    cost = pl.CostEstimate(
        flops=4 * rows * d_model * d_ff,               # 2 matmuls x 2 flops
        transcendentals=0,
        bytes_accessed=(rows_p * d_model_p * x_isz
                        + rows_p * d_model_p * o_isz
                        + weight_bytes_accessed
                        + (d_ff_pad + d_model_p) * 4),
    )

    out2d = pl.pallas_call(
        kernel,
        out_shape=jax.ShapeDtypeStruct((rows_p, d_model_p), out_dtype),
        grid_spec=pltpu.PrefetchScalarGridSpec(
            num_scalar_prefetch=0,
            grid=grid,
            in_specs=in_specs,
            out_specs=out_specs,
            scratch_shapes=scratch_shapes,
        ),
        compiler_params=pltpu.CompilerParams(
            dimension_semantics=dim_sem,
            vmem_limit_bytes=vmem_limit),
        cost_estimate=cost,
    )(x2d, w1_p, b1_p, w2_p, b2_p)

    return out2d[:rows, :d_model].reshape(batch, seq, d_model)


def _reference(x, w1, b1, w2, b2):
    h = jnp.maximum(jnp.dot(x, w1) + b1, 0.0)
    return jnp.dot(h, w2) + b2


if __name__ == "__main__":
    # Small shapes consistent with the module's forward: (batch, seq, d_model).
    batch, seq, d_model, d_ff = 2, 8, 32, 64

    key = jax.random.PRNGKey(0)
    kx, kw1, kb1, kw2, kb2 = jax.random.split(key, 5)

    x = jax.random.normal(kx, (batch, seq, d_model), dtype=jnp.float32)

    # Deterministic parameter init (PyTorch nn.Linear-style uniform bounds).
    bound1 = 1.0 / (d_model ** 0.5)
    w1 = jax.random.uniform(kw1, (d_model, d_ff), jnp.float32, -bound1, bound1)
    b1 = jax.random.uniform(kb1, (d_ff,), jnp.float32, -bound1, bound1)
    bound2 = 1.0 / (d_ff ** 0.5)
    w2 = jax.random.uniform(kw2, (d_ff, d_model), jnp.float32, -bound2, bound2)
    b2 = jax.random.uniform(kb2, (d_model,), jnp.float32, -bound2, bound2)

    ref = _reference(x, w1, b1, w2, b2)

    # Default path: bf16 MXU operands, f32 accumulation, weight-resident.
    out = jax.block_until_ready(feed_forward(x, w1, b1, w2, b2))
    assert out.shape == (batch, seq, d_model)
    assert jnp.allclose(out, ref, atol=5e-2, rtol=5e-2), "bf16 mismatch vs reference"

    # Exact f32 opt-in mode (parity with the PyTorch reference semantics).
    out_f32 = jax.block_until_ready(
        feed_forward(x, w1, b1, w2, b2, compute_dtype=jnp.float32))
    assert out_f32.shape == (batch, seq, d_model)
    assert jnp.allclose(out_f32, ref, atol=1e-5, rtol=1e-5), "f32 mismatch vs reference"

    # Chunked-reduction path with a d_ff that is not a multiple of the tile
    # (exercises the padded-tail reduction fix), exact f32.
    d_ff2 = 320
    w1b = jax.random.uniform(kw1, (d_model, d_ff2), jnp.float32, -bound1, bound1)
    b1b = jax.random.uniform(kb1, (d_ff2,), jnp.float32, -bound1, bound1)
    bound2b = 1.0 / (d_ff2 ** 0.5)
    w2b = jax.random.uniform(kw2, (d_ff2, d_model), jnp.float32, -bound2b, bound2b)
    ref2 = _reference(x, w1b, b1b, w2b, b2)
    out2 = jax.block_until_ready(
        feed_forward(x, w1b, b1b, w2b, b2, dff_tile=256,
                     compute_dtype=jnp.float32))
    assert out2.shape == (batch, seq, d_model)
    assert jnp.allclose(out2, ref2, atol=1e-4, rtol=1e-4), "chunked mismatch vs reference"

    print("KERNEL_OK")
</pallas_src>

<mosaic_0001>
module attributes {stable_mosaic.version = 11 : i64} {
  func.func @_ffn_kernel_resident(%arg0: i32, %arg1: memref<16x128xf32, #tpu.memory_space<vmem>>, %arg2: memref<128x256xbf16, #tpu.memory_space<vmem>>, %arg3: memref<1x256xf32, #tpu.memory_space<vmem>>, %arg4: memref<256x128xbf16, #tpu.memory_space<vmem>>, %arg5: memref<1x128xf32, #tpu.memory_space<vmem>>, %arg6: memref<16x128xf32, #tpu.memory_space<vmem>>) attributes {dimension_semantics = [#tpu.dimension_semantics<parallel>], iteration_bounds = array<i64: 1>, scalar_prefetch = 0 : i64, scratch_operands = 0 : i64, tpu.core_type = #tpu.core_type<tc>, window_params = [{transform_indices = @transform_0, window_bounds = array<i64: 16, 128>}, {pipeline_mode = #tpu.pipeline_mode<synchronous>, transform_indices = @transform_1, window_bounds = array<i64: 128, 256>}, {pipeline_mode = #tpu.pipeline_mode<synchronous>, transform_indices = @transform_2, window_bounds = array<i64: 1, 256>}, {pipeline_mode = #tpu.pipeline_mode<synchronous>, transform_indices = @transform_3, window_bounds = array<i64: 256, 128>}, {pipeline_mode = #tpu.pipeline_mode<synchronous>, transform_indices = @transform_4, window_bounds = array<i64: 1, 128>}, {transform_indices = @transform_5, window_bounds = array<i64: 16, 128>}]} {
    %c0 = arith.constant 0 : index
    %c0_0 = arith.constant 0 : index
    %0 = vector.load %arg1[%c0, %c0_0] : memref<16x128xf32, #tpu.memory_space<vmem>>, vector<16x128xf32>
    %1 = arith.truncf %0 : vector<16x128xf32> to vector<16x128xbf16>
    %c0_1 = arith.constant 0 : index
    %c0_2 = arith.constant 0 : index
    %2 = vector.load %arg2[%c0_1, %c0_2] : memref<128x256xbf16, #tpu.memory_space<vmem>>, vector<128x256xbf16>
    %cst = arith.constant dense<0.000000e+00> : vector<16x256xf32>
    %3 = tpu.matmul %1, %2, %cst {dimension_numbers = #tpu.dot_dimension_numbers<[1], [0], [0], [1], [0, 0, 1, 1], [], []>} : vector<16x128xbf16>, vector<128x256xbf16>, vector<16x256xf32> -> vector<16x256xf32>
    %c0_3 = arith.constant 0 : index
    %c0_4 = arith.constant 0 : index
    %4 = vector.load %arg3[%c0_3, %c0_4] : memref<1x256xf32, #tpu.memory_space<vmem>>, vector<1x256xf32>
    %5 = vector.broadcast %4 : vector<1x256xf32> to vector<16x256xf32>
    %6 = arith.addf %3, %5 : vector<16x256xf32>
    %cst_5 = arith.constant 0.000000e+00 : f32
    %7 = vector.broadcast %cst_5 : f32 to vector<16x256xf32>
    %8 = arith.maximumf %6, %7 : vector<16x256xf32>
    %9 = arith.truncf %8 : vector<16x256xf32> to vector<16x256xbf16>
    %c0_6 = arith.constant 0 : index
    %c0_7 = arith.constant 0 : index
    %10 = vector.load %arg4[%c0_6, %c0_7] : memref<256x128xbf16, #tpu.memory_space<vmem>>, vector<256x128xbf16>
    %cst_8 = arith.constant dense<0.000000e+00> : vector<16x128xf32>
    %11 = tpu.matmul %9, %10, %cst_8 {dimension_numbers = #tpu.dot_dimension_numbers<[1], [0], [0], [1], [0, 0, 1, 1], [], []>} : vector<16x256xbf16>, vector<256x128xbf16>, vector<16x128xf32> -> vector<16x128xf32>
    %c0_9 = arith.constant 0 : index
    %c0_10 = arith.constant 0 : index
    %12 = vector.load %arg5[%c0_9, %c0_10] : memref<1x128xf32, #tpu.memory_space<vmem>>, vector<1x128xf32>
    %13 = vector.broadcast %12 : vector<1x128xf32> to vector<16x128xf32>
    %14 = arith.addf %11, %13 : vector<16x128xf32>
    %c0_11 = arith.constant 0 : index
    %c0_12 = arith.constant 0 : index
    %15 = vector.load %arg6[%c0_11, %c0_12] : memref<16x128xf32, #tpu.memory_space<vmem>>, vector<16x128xf32>
    tpu.vector_store %arg6[%c0_11, %c0_12], %14 {strides = array<i32>} : memref<16x128xf32, #tpu.memory_space<vmem>>, vector<16x128xf32>,
    return
  }
  func.func @transform_0(%arg0: i32) -> (i32, i32) {
    %c0_i32 = arith.constant 0 : i32
    %c0_i32_0 = arith.constant 0 : i32
    return %arg0, %c0_i32 : i32, i32
  }
  func.func @transform_1(%arg0: i32) -> (i32, i32) {
    %c0_i32 = arith.constant 0 : i32
    %c0_i32_0 = arith.constant 0 : i32
    %c0_i32_1 = arith.constant 0 : i32
    return %c0_i32, %c0_i32_0 : i32, i32
  }
  func.func @transform_2(%arg0: i32) -> (i32, i32) {
    %c0_i32 = arith.constant 0 : i32
    %c0_i32_0 = arith.constant 0 : i32
    %c0_i32_1 = arith.constant 0 : i32
    return %c0_i32, %c0_i32_0 : i32, i32
  }
  func.func @transform_3(%arg0: i32) -> (i32, i32) {
    %c0_i32 = arith.constant 0 : i32
    %c0_i32_0 = arith.constant 0 : i32
    %c0_i32_1 = arith.constant 0 : i32
    return %c0_i32, %c0_i32_0 : i32, i32
  }
  func.func @transform_4(%arg0: i32) -> (i32, i32) {
    %c0_i32 = arith.constant 0 : i32
    %c0_i32_0 = arith.constant 0 : i32
    %c0_i32_1 = arith.constant 0 : i32
    return %c0_i32, %c0_i32_0 : i32, i32
  }
  func.func @transform_5(%arg0: i32) -> (i32, i32) {
    %c0_i32 = arith.constant 0 : i32
    %c0_i32_0 = arith.constant 0 : i32
    return %arg0, %c0_i32 : i32, i32
  }
}

</mosaic_0001>

<bundles_post_ra>
// kernel: tpu_custom_call.1
= control target key start
LH: loop header
LB: loop body
LE: loop exit
PB: predicated region body
PF: predicated region fallthrough
CT: control target
= control target key end

     0   :  { %10 = vsyncpa [#allocation3], 0  ;;  %s675_s0 = inlined_call_operand.hbm [shape: f32[16,128], index: 0, kind: input, shape index: {}]   ;;  %s676_s1 = inlined_call_operand.hbm [shape: bf16[128,256], index: 1, kind: input, shape index: {}]   ;;  %s677_s2 = inlined_call_operand.vmem [shape: f32[1,256], index: 2, kind: input, shape index: {}]   ;;  %s678_s3 = inlined_call_operand.hbm [shape: bf16[256,128], index: 3, kind: input, shape index: {}]   ;;  %s679_s4 = inlined_call_operand.vmem [shape: f32[1,128], index: 4, kind: input, shape index: {}]   ;;  %s680_s5 = inlined_call_operand.hbm [shape: f32[16,128], index: 5, kind: output, shape index: {}]  }
   0x1   :  { %11 = vsyncpa [#allocation6], 0 }
   0x2   :  { %12 = vsyncpa [#allocation4], 0  ;;  %s609_s18 = smov [#allocation5]   ;;  %s610_s20 = smov [#allocation2]  }
   0x3   :  { %s30_s19 = sshll.u32 %s609_s18, 4  ;;  %s18_s21 = sshll.u32 %s610_s20, 4  ;;  %s31_s19 = int_to_ptr.vmem [resolvable:$true] %s30_s19  ;;  %s19_s21 = int_to_ptr.vmem [resolvable:$true] %s18_s21 }
   0x4   :  { %s531_s22 = scalar_lea.vmem %s31_s19, 2048  ;;  %p536_p1 = scmp.lt.s32.totalorder %s31_s19, %s31_s19 }
   0x5   :  { %p532_p0 = scmp.ne.s32.totalorder %s31_s19, %s531_s22  ;;  %p537_p2 = scmp.lt.s32.totalorder %s531_s22, %s531_s22 }
   0x7   :  { %p538_p3 = por %p537_p2, %p536_p1 }
   0x9   :  { %p539_p4 = pnand %p538_p3, %p532_p0 }
   0xb   :  { %542 = shalt.err (!%p539_p4)
}
   0xc   :  { %s611_s23 = smov 128   ;;  %s612_s24 = smov 8  }
   0xd   :  { %36 = dma.hbm_to_vmem [thread:$0]  %s676_s1, 2048, %s31_s19, [#allocation6], %s611_s23, %s611_s23, %s612_s24  }
   0xe   :  { %s551_s27 = scalar_lea.vmem %s19_s21, 256  ;;  %p556_p6 = scmp.lt.s32.totalorder %s19_s21, %s19_s21 }
   0xf   :  { %p552_p5 = scmp.ne.s32.totalorder %s19_s21, %s551_s27  ;;  %p557_p7 = scmp.lt.s32.totalorder %s551_s27, %s551_s27 }
  0x11   :  { %p558_p8 = por %p557_p7, %p556_p6 }
  0x13   :  { %p559_p9 = pnand %p558_p8, %p552_p5 }
  0x15   :  { %562 = shalt.err (!%p559_p9)
}
  0x16   :  { %24 = dma.hbm_to_vmem [thread:$0]  %s675_s0, 256, %s19_s21, [#allocation3], %s611_s23, %s611_s23, %s612_s24  }
  0x17   :  { %s613_s30 = smov [#allocation7]  }
  0x18   :  { %s44_s6 = sshll.u32 %s613_s30, 4  ;;  %s45_s6 = int_to_ptr.vmem [resolvable:$true] %s44_s6 }
  0x19   :  { %s571_s7 = scalar_lea.vmem %s45_s6, 2048  ;;  %p576_p11 = scmp.lt.s32.totalorder %s45_s6, %s45_s6 }
  0x1a   :  { %p572_p10 = scmp.ne.s32.totalorder %s45_s6, %s571_s7  ;;  %p577_p12 = scmp.lt.s32.totalorder %s571_s7, %s571_s7 }
  0x1c   :  { %p578_p13 = por %p577_p12, %p576_p11 }
  0x1e   :  { %p579_p0 = pnand %p578_p13, %p572_p10 }
  0x20   :  { %582 = shalt.err (!%p579_p0)
}
  0x21   :  { %s614_s1 = smov 64   ;;  %s615_s8 = smov 4  }
  0x22   :  { %50 = dma.hbm_to_vmem [thread:$0]  %s678_s3, 2048, %s45_s6, [#allocation6], %s614_s1, %s614_s1, %s615_s8  }
  0x23   :  { %603 = dma.done.wait [#allocation3], 256  }
  0x24   :  { %604 = vsyncadd [#allocation3], 4294967040 }
  0x25   :  { %605 = dma.done.wait [#allocation6], 4096  }
  0x26   :  { %606 = vsyncadd [#allocation6], 4294963200  ;;  %v616_v0 = vmov 0   ;;  %v483_v1 = vld [vmem:[#allocation5 + $0x74] ss:$8 sps:$4 sm:$0xff]   ;;  %v511_v16 = vld [vmem:[#allocation7 + $0x68] sm:$0xff]   ;;  %v84_v36 = vlaneseq }
  0x27   :  { %206 = vmatprep.mubr.bf16.mxu0 %v616_v0  ;;  %v485_v2 = vld [vmem:[#allocation5 + $0x70] ss:$8 sps:$4 sm:$0xff]   ;;  %174 = vmatprep.subr.bf16.mxu0 %v483_v1  ;;  %v486_v3 = vld [vmem:[#allocation5 + $0x64] ss:$8 sps:$4 sm:$0xff]   ;;  %v488_v4 = vld [vmem:[#allocation5 + $0x60] ss:$8 sps:$4 sm:$0xff]  }
  0x28   :  { %175 = vmatpush1.bf16.msra.mxu0 %v485_v2  ;;  %v489_v5 = vld [vmem:[#allocation5 + $0x54] ss:$8 sps:$4 sm:$0xff]   ;;  %v491_v6 = vld [vmem:[#allocation5 + $0x50] ss:$8 sps:$4 sm:$0xff]   ;;  %v492_v7 = vld [vmem:[#allocation5 + $0x44] ss:$8 sps:$4 sm:$0xff]  }
  0x29   :  { %176 = vmatprep.subr.bf16.mxu0 %v486_v3  ;;  %v494_v8 = vld [vmem:[#allocation5 + $0x40] ss:$8 sps:$4 sm:$0xff]   ;;  %v495_v9 = vld [vmem:[#allocation5 + $0x34] ss:$8 sps:$4 sm:$0xff]   ;;  %v497_v11 = vld [vmem:[#allocation5 + $0x30] ss:$8 sps:$4 sm:$0xff]  }
  0x2a   :  { %v507_v10 = vld [vmem:[#allocation7 + $0x78] sm:$0xff]   ;;  %v498_v13 = vld [vmem:[#allocation5 + $0x24] ss:$8 sps:$4 sm:$0xff]   ;;  %v509_v14 = vld [vmem:[#allocation7 + $0x70] sm:$0xff]   ;;  %v85_v37 = vshrl.u32 %v84_v36, 7  ;;  %s617_s12 = smov [#allocation8]  }
  0x2b   :  { %v508_v12 = vld [vmem:[#allocation7 + $0x38] sm:$0xff]   ;;  %452 = vmatprep.subr.bf16.mxu1 %v507_v10  ;;  %v510_v15 = vld [vmem:[#allocation7 + $0x30] sm:$0xff]   ;;  %v500_v17 = vld [vmem:[#allocation5 + $0x20] ss:$8 sps:$4 sm:$0xff]   ;;  %s406_s13 = sshll.u32 %s617_s12, 4  ;;  %s407_s13 = int_to_ptr.vmem [resolvable:$true] %s406_s13 }
  0x2c   :  { %177 = vmatpush1.bf16.msra.mxu0 %v488_v4  ;;  %453 = vmatpush3.bf16.msra.mxu1 %v508_v12  ;;  %v501_v18 = vld [vmem:[#allocation5 + $0x14] ss:$8 sps:$4 sm:$0xff]   ;;  %v512_v19 = vld [vmem:[#allocation7 + $0x28] sm:$0xff]   ;;  %v513_v20 = vld [vmem:[#allocation7 + $0x60] sm:$0xff]   ;;  %v90_v38 = vsub.s32 1, %v85_v37  ;;  %v86_v39 = vsub.s32 0, %v85_v37  ;;  %p588_p2 = scmp.lt.s32.totalorder %s407_s13, %s407_s13 }
  0x2d   :  { %178 = vmatprep.subr.bf16.mxu0 %v489_v5  ;;  %454 = vmatprep.subr.bf16.mxu1 %v509_v14  ;;  %v503_v21 = vld [vmem:[#allocation5 + $0x10] ss:$8 sps:$4 sm:$0xff]   ;;  %v514_v22 = vld [vmem:[#allocation7 + $0x20] sm:$0xff]   ;;  %v519_v32 = vld [vmem:[#allocation7 + $0x48] sm:$0xff]   ;;  %s583_s14 = scalar_lea.vmem %s407_s13, 256 }
  0x2e   :  { %v504_v23 = vld [vmem:[#allocation5 + $0x4] ss:$8 sps:$4 sm:$0xff]   ;;  %v515_v24 = vld [vmem:[#allocation7 + $0x58] sm:$0xff]   ;;  %v506_v25 = vld [vmem:[#allocation5] ss:$8 sps:$4 sm:$0xff]   ;;  %p584_p1 = scmp.ne.s32.totalorder %s407_s13, %s583_s14  ;;  %p589_p3 = scmp.lt.s32.totalorder %s583_s14, %s583_s14 }
  0x2f   :  { %v63_v26 = vld [vmem:[#allocation2] sm:$0xff]  ;;  %v64_v27 = vld [vmem:[#allocation2 + $0x8] sm:$0xff]  ;;  %v520_v33 = vld [vmem:[#allocation7 + $0x8] sm:$0xff]  }
  0x30   :  { %179 = vmatpush1.bf16.msra.mxu0 %v491_v6  ;;  %455 = vmatpush3.bf16.msra.mxu1 %v510_v15  ;;  %v516_v28 = vld [vmem:[#allocation7 + $0x18] sm:$0xff]   ;;  %v65_v29 = vpack.c.bf16 %v64_v27, %v63_v26  ;;  %v517_v30 = vld [vmem:[#allocation7 + $0x50] sm:$0xff]   ;;  %v521_v34 = vld [vmem:[#allocation7 + $0x40] sm:$0xff]   ;;  %p590_p4 = por %p589_p3, %p588_p2 }
  0x31   :  { %180 = vmatprep.subr.bf16.mxu0 %v492_v7  ;;  %456 = vmatprep.subr.bf16.mxu1 %v511_v16  ;;  %v518_v31 = vld [vmem:[#allocation7 + $0x10] sm:$0xff]   ;;  %v522_v35 = vld [vmem:[#allocation7] sm:$0xff]  }
  0x32   :  { %v82_v40 = vld [vmem:[%s677_s2] sm:$0x3]  ;;  %p591_p5 = pnand %p590_p4, %p584_p1 }
  0x33   :  { %v91_v42 = vrot.slane %v82_v40, %v90_v38  ;;  %v87_v43 = vrot.slane %v82_v40, %v86_v39  ;;  %v435_v58 = vld [vmem:[%s679_s4] ss:$0 sm:$0xff] }
  0x34   :  { %181 = vmatpush1.bf16.msra.mxu0 %v494_v8  ;;  %457 = vmatpush3.bf16.msra.mxu1 %v512_v19 }
  0x35   :  { %182 = vmatprep.subr.bf16.mxu0 %v495_v9  ;;  %458 = vmatprep.subr.bf16.mxu1 %v513_v20 }
  0x38   :  { %183 = vmatpush1.bf16.msra.mxu0 %v497_v11  ;;  %459 = vmatpush3.bf16.msra.mxu1 %v514_v22 }
  0x39   :  { %184 = vmatprep.subr.bf16.mxu0 %v498_v13  ;;  %460 = vmatprep.subr.bf16.mxu1 %v515_v24 }
  0x3c   :  { %185 = vmatpush1.bf16.msra.mxu0 %v500_v17  ;;  %461 = vmatpush3.bf16.msra.mxu1 %v516_v28 }
  0x3d   :  { %186 = vmatprep.subr.bf16.mxu0 %v501_v18  ;;  %462 = vmatprep.subr.bf16.mxu1 %v517_v30 }
  0x40   :  { %187 = vmatpush1.bf16.msra.mxu0 %v503_v21  ;;  %463 = vmatpush3.bf16.msra.mxu1 %v518_v31 }
  0x41   :  { %188 = vmatprep.subr.bf16.mxu0 %v504_v23  ;;  %464 = vmatprep.subr.bf16.mxu1 %v519_v32 }
  0x44   :  { %189 = vmatpush1.bf16.msra.mxu0 %v506_v25  ;;  %465 = vmatpush3.bf16.msra.mxu1 %v520_v33 }
  0x45   :  { %466 = vmatprep.subr.bf16.mxu1 %v521_v34 }
  0x47   :  { %207 = vmatmul.mubr.bf16.vlgmr.msra.gmra.mxu0 %v65_v29 }
  0x48   :  { %467 = vmatpush3.bf16.msra.mxu1 %v522_v35 }
 0x107   :  { %v208_v41 = vpop.f32.mrf.mxu0 }
 0x108   :  { %v209_v48 = vadd.f32 %v208_v41, %v87_v43 }
 0x109   :  { %v210_v44 = vpop.f32.mrf.mxu0 }
 0x10a   :  { %v211_v46 = vadd.f32 %v210_v44, %v91_v42  ;;  %v217_v54 = vmax.f32 %v209_v48, 0.0 }
 0x10b   :  { %v212_v45 = vpop.f32.mrf.mxu0 }
 0x10c   :  { %v213_v47 = vadd.f32 %v212_v45, %v87_v43  ;;  %v218_v52 = vmax.f32 %v211_v46, 0.0 }
 0x10d   :  { %v214_v49 = vpop.f32.mrf.mxu0 }
 0x10e   :  { %v215_v50 = vadd.f32 %v214_v49, %v91_v42  ;;  %v219_v51 = vmax.f32 %v213_v47, 0.0 }
 0x110   :  { %v220_v53 = vmax.f32 %v215_v50, 0.0  ;;  %v221_v56 = vpack.c.bf16 %v219_v51, %v217_v54 }
 0x112   :  { %v222_v55 = vpack.c.bf16 %v220_v53, %v218_v52 }
 0x114   :  { %390 = vmatprep.mubr.bf16.mxu1 %v222_v55 }
 0x115   :  { %391 = vmatmul.mubr.bf16.vlgmr.msra.gmra.mxu1 %v221_v56 }
 0x1d5   :  { %v468_v57 = vpop.f32.mrf.mxu1 }
 0x1d7   :  { %v469_v59 = vpop.f32.mrf.mxu1 }
 0x1d8   :  { %v470_v60 = vadd.f32 %v469_v59, %v468_v57 }
 0x1d9   :  { %v471_v61 = vpop.f32.mrf.mxu1 }
 0x1da   :  { %v393_v62 = vadd.f32 %v470_v60, %v435_v58 }
 0x1db   :  { %v472_v63 = vpop.f32.mrf.mxu1 }
 0x1dc   :  { %399 = vst [vmem:[#allocation8] sm:$0xff] %v393_v62  ;;  %v473_v0 = vadd.f32 %v472_v63, %v471_v61 }
 0x1de   :  { %v396_v1 = vadd.f32 %v473_v0, %v435_v58 }
 0x1e0   :  { %400 = vst [vmem:[#allocation8 + $0x8] sm:$0xff] %v396_v1 }
 0x1e1   :  { %594 = shalt.err (!%p591_p5)
}
 0x1e2   :  { %412 = dma.vmem_to_hbm [thread:$0]  %s407_s13, 256, %s680_s5, [#allocation4], %s611_s23, %s611_s23, %s612_s24  }
 0x1e3   :  { %607 = dma.done.wait [#allocation4], 256  }
 0x1e4   :  { %608 = vsyncadd [#allocation4], 4294967040 }
 0x1e5   :  { %416 = vsyncpa [#allocation3], 1 }
 0x1e6   :  { %417 = vsyncpa [#allocation6], 1 }
 0x1e7   :  { %418 = vsyncpa [#allocation4], 1 }

</bundles_post_ra>
